<compile_context>
chip_gen: v7x
topology: tpu7x:2x2x1
jax: 0.10.0
libtpu: 0.0.40
codegen_flags: <defaults>
</compile_context>

<pallas_src>
import jax
import jax.numpy as jnp
from jax.experimental import pallas as pl
from jax.experimental.pallas import tpu as pltpu

B = 2       # batch
T = 8       # max sequence length
I = 1       # GRU input size
H = 16      # GRU hidden size
O = 5       # fc out_features

BP = 8      # batch padded to a full sublane group
G = 128     # single 128-lane tile holding all three packed gates (n | z | r | zero-pad)


def gru_fc_kernel(x_ref, len_ref, wih_ref, whh_ref, bi_ref, bhn_ref,
                  wfc_ref, bfc_ref, out_ref):
    """Fused GRU recurrence + final Linear, all gates packed in one 128-lane tile.

    x_ref   : (T, BP, G) f32  input value broadcast across all 128 lanes (input size == 1)
    len_ref : (BP, G)    f32  per-row sequence length broadcast across lanes
    wih_ref : (BP, G)    f32  W_ih^T packed [n|z|r], pre-broadcast over sublanes
    whh_ref : (G, G)     f32  W_hh^T, rows 0-15 real, cols packed [n|z|r], rest zero
    bi_ref  : (BP, G)    f32  [b_in, b_iz+b_hz, b_ir+b_hr] packed, pre-broadcast
    bhn_ref : (BP, G)    f32  b_hn at lanes 0-15 (stays inside r*(...)), pre-broadcast
    wfc_ref : (G, G)     f32  fc.weight^T zero-padded (rows 0-15, cols 0-4 real)
    bfc_ref : (BP, G)    f32  fc.bias zero-padded, pre-broadcast
    out_ref : (BP, G)    f32  lane-dense output slab (real data in [:B, :O])
    """
    t_len, bp, lanes = x_ref.shape

    # Loop-invariant 1-vreg operands, hoisted.
    len_v = len_ref[...]                                     # (BP, G)
    bhn = bhn_ref[...]                                       # (BP, G)

    # Input projection for every timestep in one vectorized pass (independent of h,
    # off the serial critical path), kept as values (T = 8 vregs, no scratch round-trip).
    gi_all = (x_ref[...] * wih_ref[...][None, :, :]
              + bi_ref[...][None, :, :])                     # (T, BP, G)

    h = jnp.zeros((bp, lanes), jnp.float32)                  # hidden state at lanes 0-15
    for t in range(t_len):                                   # T = 8, fully unrolled
        gi = gi_all[t]                                       # (BP, G)
        # One 128x128 MXU tile per step; RHS indexed from VMEM each step so it is not
        # pinned in vregs across the unrolled loop.
        gh = jnp.dot(h, whh_ref[...], preferred_element_type=jnp.float32)   # (BP, G)

        # Whole-vreg sigmoid: z at lanes 16-31, r at lanes 32-47 (lane 0-15 values unused).
        s = jax.nn.sigmoid(gi + gh)
        # Align r and z with the hidden lanes 0-15 via XLU lane rotations (jnp.roll semantics).
        r_al = pltpu.roll(s, shift=96, axis=1)               # lanes 32-47 -> 0-15
        z_al = pltpu.roll(s, shift=112, axis=1)              # lanes 16-31 -> 0-15

        # PyTorch GRU: n = tanh(W_in x + b_in + r * (W_hn h + b_hn))
        n = jnp.tanh(gi + r_al * (gh + bhn))
        # Strength-reduced blend: (1-z)*n + z*h  ==  n + z*(h - n)
        h_new = n + z_al * (h - n)

        # Variable-length handling: freeze h once t >= length[b] (one vcmp + vsel).
        m = jnp.float32(t) < len_v
        h = jnp.where(m, h_new, h)

    out_ref[...] = (jnp.dot(h, wfc_ref[...], preferred_element_type=jnp.float32)
                    + bfc_ref[...])


def my_variable_rnn_forward(x, lengths, params):
    """x: (B, T, 1) f32 batch_first; lengths: (B,) int. Returns (B, 5)."""
    w_ih, w_hh, b_ih, b_hh, w_fc, b_fc = params
    bsz, t_len, _ = x.shape
    f32 = jnp.float32
    w_ih = w_ih.astype(f32); w_hh = w_hh.astype(f32)
    b_ih = b_ih.astype(f32); b_hh = b_hh.astype(f32)
    w_fc = w_fc.astype(f32); b_fc = b_fc.astype(f32)

    # ---- pack the three GRU gates into ONE 128-lane tile: n @ 0-15, z @ 16-31, r @ 32-47 ----
    # PyTorch gate order in the stacked weights/biases is [r | z | n].
    wih = jnp.zeros((G,), f32)
    wih = wih.at[0:H].set(w_ih[2 * H:3 * H, 0])              # n
    wih = wih.at[H:2 * H].set(w_ih[H:2 * H, 0])              # z
    wih = wih.at[2 * H:3 * H].set(w_ih[0:H, 0])              # r
    wih = jnp.broadcast_to(wih, (BP, G))

    whh = jnp.zeros((G, G), f32)
    whh = whh.at[0:H, 0:H].set(w_hh[2 * H:3 * H, :].T)       # W_hn^T
    whh = whh.at[0:H, H:2 * H].set(w_hh[H:2 * H, :].T)       # W_hz^T
    whh = whh.at[0:H, 2 * H:3 * H].set(w_hh[0:H, :].T)       # W_hr^T

    # Pre-sum r/z biases; keep b_hn separate (it lives inside the r*(...) term).
    bi = jnp.zeros((G,), f32)
    bi = bi.at[0:H].set(b_ih[2 * H:3 * H])                   # b_in only
    bi = bi.at[H:2 * H].set(b_ih[H:2 * H] + b_hh[H:2 * H])   # b_iz + b_hz
    bi = bi.at[2 * H:3 * H].set(b_ih[0:H] + b_hh[0:H])       # b_ir + b_hr
    bi = jnp.broadcast_to(bi, (BP, G))

    bhn = jnp.broadcast_to(jnp.zeros((G,), f32).at[0:H].set(b_hh[2 * H:3 * H]), (BP, G))

    wfc = jnp.zeros((G, G), f32).at[0:H, 0:O].set(w_fc.T)
    bfc = jnp.broadcast_to(jnp.zeros((G,), f32).at[0:O].set(b_fc), (BP, G))

    # Lane-dense inputs: x pre-broadcast across lanes (multiplies lane-for-lane against wih,
    # no in-kernel relayout); lengths as a single (BP, 128) vector instead of a (T,BP,G) mask.
    x_tb = jnp.zeros((t_len, BP), f32).at[:, :bsz].set(x[:, :, 0].T)
    x_b = jnp.broadcast_to(x_tb[:, :, None], (t_len, BP, G))
    len_p = jnp.zeros((BP,), f32).at[:bsz].set(lengths.astype(f32))
    len_f = jnp.broadcast_to(len_p[:, None], (BP, G))

    # TODO(synk): if batch ever grows past one sublane group, add a leading batch grid axis
    # with dimension_semantics=("parallel",) so v7x's second TensorCore shares the work.
    vmem = pl.BlockSpec(memory_space=pltpu.MemorySpace.VMEM)
    out_pad = pl.pallas_call(
        gru_fc_kernel,
        out_shape=jax.ShapeDtypeStruct((BP, G), f32),
        in_specs=[vmem] * 8,
        out_specs=vmem,
    )(x_b, len_f, wih, whh, bi, bhn, wfc, bfc)

    return out_pad[:bsz, :O]


def reference_forward(x, lengths, params):
    """Pure-JAX reference matching torch.nn.GRU (packed-sequence last hidden) + Linear."""
    w_ih, w_hh, b_ih, b_hh, w_fc, b_fc = params
    bsz = x.shape[0]
    h = jnp.zeros((bsz, H), jnp.float32)
    for t in range(x.shape[1]):
        x_t = x[:, t, :]                                     # (B, 1)
        gi = x_t @ w_ih.T + b_ih                             # (B, 3H)
        gh = h @ w_hh.T + b_hh                               # (B, 3H)
        r = jax.nn.sigmoid(gi[:, :H] + gh[:, :H])
        z = jax.nn.sigmoid(gi[:, H:2 * H] + gh[:, H:2 * H])
        n = jnp.tanh(gi[:, 2 * H:] + r * gh[:, 2 * H:])
        h_new = (1.0 - z) * n + z * h
        m = (t < lengths).astype(jnp.float32)[:, None]
        h = m * h_new + (1.0 - m) * h
    return h @ w_fc.T + b_fc


def init_params(key):
    """Deterministic init mimicking PyTorch's U(-1/sqrt(H), 1/sqrt(H))."""
    k = 1.0 / jnp.sqrt(jnp.float32(H))
    ks = jax.random.split(key, 6)
    w_ih = jax.random.uniform(ks[0], (3 * H, I), jnp.float32, -k, k)
    w_hh = jax.random.uniform(ks[1], (3 * H, H), jnp.float32, -k, k)
    b_ih = jax.random.uniform(ks[2], (3 * H,), jnp.float32, -k, k)
    b_hh = jax.random.uniform(ks[3], (3 * H,), jnp.float32, -k, k)
    w_fc = jax.random.uniform(ks[4], (O, H), jnp.float32, -k, k)
    b_fc = jax.random.uniform(ks[5], (O,), jnp.float32, -k, k)
    return (w_ih, w_hh, b_ih, b_hh, w_fc, b_fc)


if __name__ == "__main__":
    root = jax.random.PRNGKey(0)
    kx, kp = jax.random.split(root)
    x = jax.random.normal(kx, (B, T, I), jnp.float32)        # (batch, seq, input) batch_first
    lengths = jnp.array([T, 5], dtype=jnp.int32)             # variable-length sequences
    params = init_params(kp)

    out = my_variable_rnn_forward(x, lengths, params)
    out = jax.block_until_ready(out)

    ref = reference_forward(x, lengths, params)
    assert out.shape == (B, O)
    assert jnp.allclose(out, ref, rtol=1e-3, atol=1e-3), (out, ref)

    print("KERNEL_OK")
</pallas_src>

<mosaic_0001>
module attributes {stable_mosaic.version = 11 : i64} {
  func.func @gru_fc_kernel(%arg0: memref<8x8x128xf32, #tpu.memory_space<vmem>>, %arg1: memref<8x128xf32, #tpu.memory_space<vmem>>, %arg2: memref<8x128xf32, #tpu.memory_space<vmem>>, %arg3: memref<128x128xf32, #tpu.memory_space<vmem>>, %arg4: memref<8x128xf32, #tpu.memory_space<vmem>>, %arg5: memref<8x128xf32, #tpu.memory_space<vmem>>, %arg6: memref<128x128xf32, #tpu.memory_space<vmem>>, %arg7: memref<8x128xf32, #tpu.memory_space<vmem>>, %arg8: memref<8x128xf32, #tpu.memory_space<vmem>>) attributes {dimension_semantics = [], scalar_prefetch = 0 : i64, scratch_operands = 0 : i64, tpu.core_type = #tpu.core_type<tc>} {
    %c0 = arith.constant 0 : index
    %c0_0 = arith.constant 0 : index
    %0 = vector.load %arg1[%c0, %c0_0] : memref<8x128xf32, #tpu.memory_space<vmem>>, vector<8x128xf32>
    %c0_1 = arith.constant 0 : index
    %c0_2 = arith.constant 0 : index
    %1 = vector.load %arg5[%c0_1, %c0_2] : memref<8x128xf32, #tpu.memory_space<vmem>>, vector<8x128xf32>
    %c0_3 = arith.constant 0 : index
    %c0_4 = arith.constant 0 : index
    %c0_5 = arith.constant 0 : index
    %2 = vector.load %arg0[%c0_3, %c0_4, %c0_5] : memref<8x8x128xf32, #tpu.memory_space<vmem>>, vector<8x8x128xf32>
    %c0_6 = arith.constant 0 : index
    %c0_7 = arith.constant 0 : index
    %3 = vector.load %arg2[%c0_6, %c0_7] : memref<8x128xf32, #tpu.memory_space<vmem>>, vector<8x128xf32>
    %4 = vector.shape_cast %3 : vector<8x128xf32> to vector<1x8x128xf32>
    %5 = vector.broadcast %4 : vector<1x8x128xf32> to vector<8x8x128xf32>
    %6 = arith.mulf %2, %5 : vector<8x8x128xf32>
    %c0_8 = arith.constant 0 : index
    %c0_9 = arith.constant 0 : index
    %7 = vector.load %arg4[%c0_8, %c0_9] : memref<8x128xf32, #tpu.memory_space<vmem>>, vector<8x128xf32>
    %8 = vector.shape_cast %7 : vector<8x128xf32> to vector<1x8x128xf32>
    %9 = vector.broadcast %8 : vector<1x8x128xf32> to vector<8x8x128xf32>
    %10 = arith.addf %6, %9 : vector<8x8x128xf32>
    %cst = arith.constant 0.000000e+00 : f32
    %11 = vector.broadcast %cst : f32 to vector<8x128xf32>
    %12 = vector.extract_strided_slice %10 {offsets = [0, 0, 0], sizes = [1, 8, 128], strides = [1, 1, 1]} : vector<8x8x128xf32> to vector<1x8x128xf32>
    %13 = vector.shape_cast %12 : vector<1x8x128xf32> to vector<8x128xf32>
    %c0_10 = arith.constant 0 : index
    %c0_11 = arith.constant 0 : index
    %14 = vector.load %arg3[%c0_10, %c0_11] : memref<128x128xf32, #tpu.memory_space<vmem>>, vector<128x128xf32>
    %cst_12 = arith.constant dense<0.000000e+00> : vector<8x128xf32>
    %15 = tpu.matmul %11, %14, %cst_12 {dimension_numbers = #tpu.dot_dimension_numbers<[1], [0], [0], [1], [0, 0, 1, 1], [], []>} : vector<8x128xf32>, vector<128x128xf32>, vector<8x128xf32> -> vector<8x128xf32>
    %16 = arith.addf %13, %15 : vector<8x128xf32>
    %17 = arith.negf %16 : vector<8x128xf32>
    %18 = math.exp %17 : vector<8x128xf32>
    %cst_13 = arith.constant 1.000000e+00 : f32
    %19 = vector.broadcast %cst_13 : f32 to vector<8x128xf32>
    %20 = arith.addf %19, %18 : vector<8x128xf32>
    %21 = arith.divf %19, %20 : vector<8x128xf32>
    %c96_i32 = arith.constant 96 : i32
    %22 = tpu.dynamic_rotate %21 by %c96_i32 dim 1 : vector<8x128xf32>, i32 -> vector<8x128xf32>
    %c112_i32 = arith.constant 112 : i32
    %23 = tpu.dynamic_rotate %21 by %c112_i32 dim 1 : vector<8x128xf32>, i32 -> vector<8x128xf32>
    %24 = arith.addf %15, %1 : vector<8x128xf32>
    %25 = arith.mulf %22, %24 : vector<8x128xf32>
    %26 = arith.addf %13, %25 : vector<8x128xf32>
    %27 = math.tanh %26 : vector<8x128xf32>
    %28 = arith.subf %11, %27 : vector<8x128xf32>
    %29 = arith.mulf %23, %28 : vector<8x128xf32>
    %30 = arith.addf %27, %29 : vector<8x128xf32>
    %cst_14 = arith.constant 0.000000e+00 : f32
    %31 = vector.broadcast %cst_14 : f32 to vector<8x128xf32>
    %32 = arith.cmpf olt, %31, %0 : vector<8x128xf32>
    %33 = arith.select %32, %30, %11 : vector<8x128xi1>, vector<8x128xf32>
    %34 = vector.extract_strided_slice %10 {offsets = [1, 0, 0], sizes = [1, 8, 128], strides = [1, 1, 1]} : vector<8x8x128xf32> to vector<1x8x128xf32>
    %35 = vector.shape_cast %34 : vector<1x8x128xf32> to vector<8x128xf32>
    %c0_15 = arith.constant 0 : index
    %c0_16 = arith.constant 0 : index
    %36 = vector.load %arg3[%c0_15, %c0_16] : memref<128x128xf32, #tpu.memory_space<vmem>>, vector<128x128xf32>
    %cst_17 = arith.constant dense<0.000000e+00> : vector<8x128xf32>
    %37 = tpu.matmul %33, %36, %cst_17 {dimension_numbers = #tpu.dot_dimension_numbers<[1], [0], [0], [1], [0, 0, 1, 1], [], []>} : vector<8x128xf32>, vector<128x128xf32>, vector<8x128xf32> -> vector<8x128xf32>
    %38 = arith.addf %35, %37 : vector<8x128xf32>
    %39 = arith.negf %38 : vector<8x128xf32>
    %40 = math.exp %39 : vector<8x128xf32>
    %cst_18 = arith.constant 1.000000e+00 : f32
    %41 = vector.broadcast %cst_18 : f32 to vector<8x128xf32>
    %42 = arith.addf %41, %40 : vector<8x128xf32>
    %43 = arith.divf %41, %42 : vector<8x128xf32>
    %c96_i32_19 = arith.constant 96 : i32
    %44 = tpu.dynamic_rotate %43 by %c96_i32_19 dim 1 : vector<8x128xf32>, i32 -> vector<8x128xf32>
    %c112_i32_20 = arith.constant 112 : i32
    %45 = tpu.dynamic_rotate %43 by %c112_i32_20 dim 1 : vector<8x128xf32>, i32 -> vector<8x128xf32>
    %46 = arith.addf %37, %1 : vector<8x128xf32>
    %47 = arith.mulf %44, %46 : vector<8x128xf32>
    %48 = arith.addf %35, %47 : vector<8x128xf32>
    %49 = math.tanh %48 : vector<8x128xf32>
    %50 = arith.subf %33, %49 : vector<8x128xf32>
    %51 = arith.mulf %45, %50 : vector<8x128xf32>
    %52 = arith.addf %49, %51 : vector<8x128xf32>
    %cst_21 = arith.constant 1.000000e+00 : f32
    %53 = vector.broadcast %cst_21 : f32 to vector<8x128xf32>
    %54 = arith.cmpf olt, %53, %0 : vector<8x128xf32>
    %55 = arith.select %54, %52, %33 : vector<8x128xi1>, vector<8x128xf32>
    %56 = vector.extract_strided_slice %10 {offsets = [2, 0, 0], sizes = [1, 8, 128], strides = [1, 1, 1]} : vector<8x8x128xf32> to vector<1x8x128xf32>
    %57 = vector.shape_cast %56 : vector<1x8x128xf32> to vector<8x128xf32>
    %c0_22 = arith.constant 0 : index
    %c0_23 = arith.constant 0 : index
    %58 = vector.load %arg3[%c0_22, %c0_23] : memref<128x128xf32, #tpu.memory_space<vmem>>, vector<128x128xf32>
    %cst_24 = arith.constant dense<0.000000e+00> : vector<8x128xf32>
    %59 = tpu.matmul %55, %58, %cst_24 {dimension_numbers = #tpu.dot_dimension_numbers<[1], [0], [0], [1], [0, 0, 1, 1], [], []>} : vector<8x128xf32>, vector<128x128xf32>, vector<8x128xf32> -> vector<8x128xf32>
    %60 = arith.addf %57, %59 : vector<8x128xf32>
    %61 = arith.negf %60 : vector<8x128xf32>
    %62 = math.exp %61 : vector<8x128xf32>
    %cst_25 = arith.constant 1.000000e+00 : f32
    %63 = vector.broadcast %cst_25 : f32 to vector<8x128xf32>
    %64 = arith.addf %63, %62 : vector<8x128xf32>
    %65 = arith.divf %63, %64 : vector<8x128xf32>
    %c96_i32_26 = arith.constant 96 : i32
    %66 = tpu.dynamic_rotate %65 by %c96_i32_26 dim 1 : vector<8x128xf32>, i32 -> vector<8x128xf32>
    %c112_i32_27 = arith.constant 112 : i32
    %67 = tpu.dynamic_rotate %65 by %c112_i32_27 dim 1 : vector<8x128xf32>, i32 -> vector<8x128xf32>
    %68 = arith.addf %59, %1 : vector<8x128xf32>
    %69 = arith.mulf %66, %68 : vector<8x128xf32>
    %70 = arith.addf %57, %69 : vector<8x128xf32>
    %71 = math.tanh %70 : vector<8x128xf32>
    %72 = arith.subf %55, %71 : vector<8x128xf32>
    %73 = arith.mulf %67, %72 : vector<8x128xf32>
    %74 = arith.addf %71, %73 : vector<8x128xf32>
    %cst_28 = arith.constant 2.000000e+00 : f32
    %75 = vector.broadcast %cst_28 : f32 to vector<8x128xf32>
    %76 = arith.cmpf olt, %75, %0 : vector<8x128xf32>
    %77 = arith.select %76, %74, %55 : vector<8x128xi1>, vector<8x128xf32>
    %78 = vector.extract_strided_slice %10 {offsets = [3, 0, 0], sizes = [1, 8, 128], strides = [1, 1, 1]} : vector<8x8x128xf32> to vector<1x8x128xf32>
    %79 = vector.shape_cast %78 : vector<1x8x128xf32> to vector<8x128xf32>
    %c0_29 = arith.constant 0 : index
    %c0_30 = arith.constant 0 : index
    %80 = vector.load %arg3[%c0_29, %c0_30] : memref<128x128xf32, #tpu.memory_space<vmem>>, vector<128x128xf32>
    %cst_31 = arith.constant dense<0.000000e+00> : vector<8x128xf32>
    %81 = tpu.matmul %77, %80, %cst_31 {dimension_numbers = #tpu.dot_dimension_numbers<[1], [0], [0], [1], [0, 0, 1, 1], [], []>} : vector<8x128xf32>, vector<128x128xf32>, vector<8x128xf32> -> vector<8x128xf32>
    %82 = arith.addf %79, %81 : vector<8x128xf32>
    %83 = arith.negf %82 : vector<8x128xf32>
    %84 = math.exp %83 : vector<8x128xf32>
    %cst_32 = arith.constant 1.000000e+00 : f32
    %85 = vector.broadcast %cst_32 : f32 to vector<8x128xf32>
    %86 = arith.addf %85, %84 : vector<8x128xf32>
    %87 = arith.divf %85, %86 : vector<8x128xf32>
    %c96_i32_33 = arith.constant 96 : i32
    %88 = tpu.dynamic_rotate %87 by %c96_i32_33 dim 1 : vector<8x128xf32>, i32 -> vector<8x128xf32>
    %c112_i32_34 = arith.constant 112 : i32
    %89 = tpu.dynamic_rotate %87 by %c112_i32_34 dim 1 : vector<8x128xf32>, i32 -> vector<8x128xf32>
    %90 = arith.addf %81, %1 : vector<8x128xf32>
    %91 = arith.mulf %88, %90 : vector<8x128xf32>
    %92 = arith.addf %79, %91 : vector<8x128xf32>
    %93 = math.tanh %92 : vector<8x128xf32>
    %94 = arith.subf %77, %93 : vector<8x128xf32>
    %95 = arith.mulf %89, %94 : vector<8x128xf32>
    %96 = arith.addf %93, %95 : vector<8x128xf32>
    %cst_35 = arith.constant 3.000000e+00 : f32
    %97 = vector.broadcast %cst_35 : f32 to vector<8x128xf32>
    %98 = arith.cmpf olt, %97, %0 : vector<8x128xf32>
    %99 = arith.select %98, %96, %77 : vector<8x128xi1>, vector<8x128xf32>
    %100 = vector.extract_strided_slice %10 {offsets = [4, 0, 0], sizes = [1, 8, 128], strides = [1, 1, 1]} : vector<8x8x128xf32> to vector<1x8x128xf32>
    %101 = vector.shape_cast %100 : vector<1x8x128xf32> to vector<8x128xf32>
    %c0_36 = arith.constant 0 : index
    %c0_37 = arith.constant 0 : index
    %102 = vector.load %arg3[%c0_36, %c0_37] : memref<128x128xf32, #tpu.memory_space<vmem>>, vector<128x128xf32>
    %cst_38 = arith.constant dense<0.000000e+00> : vector<8x128xf32>
    %103 = tpu.matmul %99, %102, %cst_38 {dimension_numbers = #tpu.dot_dimension_numbers<[1], [0], [0], [1], [0, 0, 1, 1], [], []>} : vector<8x128xf32>, vector<128x128xf32>, vector<8x128xf32> -> vector<8x128xf32>
    %104 = arith.addf %101, %103 : vector<8x128xf32>
    %105 = arith.negf %104 : vector<8x128xf32>
    %106 = math.exp %105 : vector<8x128xf32>
    %cst_39 = arith.constant 1.000000e+00 : f32
    %107 = vector.broadcast %cst_39 : f32 to vector<8x128xf32>
    %108 = arith.addf %107, %106 : vector<8x128xf32>
    %109 = arith.divf %107, %108 : vector<8x128xf32>
    %c96_i32_40 = arith.constant 96 : i32
    %110 = tpu.dynamic_rotate %109 by %c96_i32_40 dim 1 : vector<8x128xf32>, i32 -> vector<8x128xf32>
    %c112_i32_41 = arith.constant 112 : i32
    %111 = tpu.dynamic_rotate %109 by %c112_i32_41 dim 1 : vector<8x128xf32>, i32 -> vector<8x128xf32>
    %112 = arith.addf %103, %1 : vector<8x128xf32>
    %113 = arith.mulf %110, %112 : vector<8x128xf32>
    %114 = arith.addf %101, %113 : vector<8x128xf32>
    %115 = math.tanh %114 : vector<8x128xf32>
    %116 = arith.subf %99, %115 : vector<8x128xf32>
    %117 = arith.mulf %111, %116 : vector<8x128xf32>
    %118 = arith.addf %115, %117 : vector<8x128xf32>
    %cst_42 = arith.constant 4.000000e+00 : f32
    %119 = vector.broadcast %cst_42 : f32 to vector<8x128xf32>
    %120 = arith.cmpf olt, %119, %0 : vector<8x128xf32>
    %121 = arith.select %120, %118, %99 : vector<8x128xi1>, vector<8x128xf32>
    %122 = vector.extract_strided_slice %10 {offsets = [5, 0, 0], sizes = [1, 8, 128], strides = [1, 1, 1]} : vector<8x8x128xf32> to vector<1x8x128xf32>
    %123 = vector.shape_cast %122 : vector<1x8x128xf32> to vector<8x128xf32>
    %c0_43 = arith.constant 0 : index
    %c0_44 = arith.constant 0 : index
    %124 = vector.load %arg3[%c0_43, %c0_44] : memref<128x128xf32, #tpu.memory_space<vmem>>, vector<128x128xf32>
    %cst_45 = arith.constant dense<0.000000e+00> : vector<8x128xf32>
    %125 = tpu.matmul %121, %124, %cst_45 {dimension_numbers = #tpu.dot_dimension_numbers<[1], [0], [0], [1], [0, 0, 1, 1], [], []>} : vector<8x128xf32>, vector<128x128xf32>, vector<8x128xf32> -> vector<8x128xf32>
    %126 = arith.addf %123, %125 : vector<8x128xf32>
    %127 = arith.negf %126 : vector<8x128xf32>
    %128 = math.exp %127 : vector<8x128xf32>
    %cst_46 = arith.constant 1.000000e+00 : f32
    %129 = vector.broadcast %cst_46 : f32 to vector<8x128xf32>
    %130 = arith.addf %129, %128 : vector<8x128xf32>
    %131 = arith.divf %129, %130 : vector<8x128xf32>
    %c96_i32_47 = arith.constant 96 : i32
    %132 = tpu.dynamic_rotate %131 by %c96_i32_47 dim 1 : vector<8x128xf32>, i32 -> vector<8x128xf32>
    %c112_i32_48 = arith.constant 112 : i32
    %133 = tpu.dynamic_rotate %131 by %c112_i32_48 dim 1 : vector<8x128xf32>, i32 -> vector<8x128xf32>
    %134 = arith.addf %125, %1 : vector<8x128xf32>
    %135 = arith.mulf %132, %134 : vector<8x128xf32>
    %136 = arith.addf %123, %135 : vector<8x128xf32>
    %137 = math.tanh %136 : vector<8x128xf32>
    %138 = arith.subf %121, %137 : vector<8x128xf32>
    %139 = arith.mulf %133, %138 : vector<8x128xf32>
    %140 = arith.addf %137, %139 : vector<8x128xf32>
    %cst_49 = arith.constant 5.000000e+00 : f32
    %141 = vector.broadcast %cst_49 : f32 to vector<8x128xf32>
    %142 = arith.cmpf olt, %141, %0 : vector<8x128xf32>
    %143 = arith.select %142, %140, %121 : vector<8x128xi1>, vector<8x128xf32>
    %144 = vector.extract_strided_slice %10 {offsets = [6, 0, 0], sizes = [1, 8, 128], strides = [1, 1, 1]} : vector<8x8x128xf32> to vector<1x8x128xf32>
    %145 = vector.shape_cast %144 : vector<1x8x128xf32> to vector<8x128xf32>
    %c0_50 = arith.constant 0 : index
    %c0_51 = arith.constant 0 : index
    %146 = vector.load %arg3[%c0_50, %c0_51] : memref<128x128xf32, #tpu.memory_space<vmem>>, vector<128x128xf32>
    %cst_52 = arith.constant dense<0.000000e+00> : vector<8x128xf32>
    %147 = tpu.matmul %143, %146, %cst_52 {dimension_numbers = #tpu.dot_dimension_numbers<[1], [0], [0], [1], [0, 0, 1, 1], [], []>} : vector<8x128xf32>, vector<128x128xf32>, vector<8x128xf32> -> vector<8x128xf32>
    %148 = arith.addf %145, %147 : vector<8x128xf32>
    %149 = arith.negf %148 : vector<8x128xf32>
    %150 = math.exp %149 : vector<8x128xf32>
    %cst_53 = arith.constant 1.000000e+00 : f32
    %151 = vector.broadcast %cst_53 : f32 to vector<8x128xf32>
    %152 = arith.addf %151, %150 : vector<8x128xf32>
    %153 = arith.divf %151, %152 : vector<8x128xf32>
    %c96_i32_54 = arith.constant 96 : i32
    %154 = tpu.dynamic_rotate %153 by %c96_i32_54 dim 1 : vector<8x128xf32>, i32 -> vector<8x128xf32>
    %c112_i32_55 = arith.constant 112 : i32
    %155 = tpu.dynamic_rotate %153 by %c112_i32_55 dim 1 : vector<8x128xf32>, i32 -> vector<8x128xf32>
    %156 = arith.addf %147, %1 : vector<8x128xf32>
    %157 = arith.mulf %154, %156 : vector<8x128xf32>
    %158 = arith.addf %145, %157 : vector<8x128xf32>
    %159 = math.tanh %158 : vector<8x128xf32>
    %160 = arith.subf %143, %159 : vector<8x128xf32>
    %161 = arith.mulf %155, %160 : vector<8x128xf32>
    %162 = arith.addf %159, %161 : vector<8x128xf32>
    %cst_56 = arith.constant 6.000000e+00 : f32
    %163 = vector.broadcast %cst_56 : f32 to vector<8x128xf32>
    %164 = arith.cmpf olt, %163, %0 : vector<8x128xf32>
    %165 = arith.select %164, %162, %143 : vector<8x128xi1>, vector<8x128xf32>
    %166 = vector.extract_strided_slice %10 {offsets = [7, 0, 0], sizes = [1, 8, 128], strides = [1, 1, 1]} : vector<8x8x128xf32> to vector<1x8x128xf32>
    %167 = vector.shape_cast %166 : vector<1x8x128xf32> to vector<8x128xf32>
    %c0_57 = arith.constant 0 : index
    %c0_58 = arith.constant 0 : index
    %168 = vector.load %arg3[%c0_57, %c0_58] : memref<128x128xf32, #tpu.memory_space<vmem>>, vector<128x128xf32>
    %cst_59 = arith.constant dense<0.000000e+00> : vector<8x128xf32>
    %169 = tpu.matmul %165, %168, %cst_59 {dimension_numbers = #tpu.dot_dimension_numbers<[1], [0], [0], [1], [0, 0, 1, 1], [], []>} : vector<8x128xf32>, vector<128x128xf32>, vector<8x128xf32> -> vector<8x128xf32>
    %170 = arith.addf %167, %169 : vector<8x128xf32>
    %171 = arith.negf %170 : vector<8x128xf32>
    %172 = math.exp %171 : vector<8x128xf32>
    %cst_60 = arith.constant 1.000000e+00 : f32
    %173 = vector.broadcast %cst_60 : f32 to vector<8x128xf32>
    %174 = arith.addf %173, %172 : vector<8x128xf32>
    %175 = arith.divf %173, %174 : vector<8x128xf32>
    %c96_i32_61 = arith.constant 96 : i32
    %176 = tpu.dynamic_rotate %175 by %c96_i32_61 dim 1 : vector<8x128xf32>, i32 -> vector<8x128xf32>
    %c112_i32_62 = arith.constant 112 : i32
    %177 = tpu.dynamic_rotate %175 by %c112_i32_62 dim 1 : vector<8x128xf32>, i32 -> vector<8x128xf32>
    %178 = arith.addf %169, %1 : vector<8x128xf32>
    %179 = arith.mulf %176, %178 : vector<8x128xf32>
    %180 = arith.addf %167, %179 : vector<8x128xf32>
    %181 = math.tanh %180 : vector<8x128xf32>
    %182 = arith.subf %165, %181 : vector<8x128xf32>
    %183 = arith.mulf %177, %182 : vector<8x128xf32>
    %184 = arith.addf %181, %183 : vector<8x128xf32>
    %cst_63 = arith.constant 7.000000e+00 : f32
    %185 = vector.broadcast %cst_63 : f32 to vector<8x128xf32>
    %186 = arith.cmpf olt, %185, %0 : vector<8x128xf32>
    %187 = arith.select %186, %184, %165 : vector<8x128xi1>, vector<8x128xf32>
    %c0_64 = arith.constant 0 : index
    %c0_65 = arith.constant 0 : index
    %188 = vector.load %arg6[%c0_64, %c0_65] : memref<128x128xf32, #tpu.memory_space<vmem>>, vector<128x128xf32>
    %cst_66 = arith.constant dense<0.000000e+00> : vector<8x128xf32>
    %189 = tpu.matmul %187, %188, %cst_66 {dimension_numbers = #tpu.dot_dimension_numbers<[1], [0], [0], [1], [0, 0, 1, 1], [], []>} : vector<8x128xf32>, vector<128x128xf32>, vector<8x128xf32> -> vector<8x128xf32>
    %c0_67 = arith.constant 0 : index
    %c0_68 = arith.constant 0 : index
    %190 = vector.load %arg7[%c0_67, %c0_68] : memref<8x128xf32, #tpu.memory_space<vmem>>, vector<8x128xf32>
    %191 = arith.addf %189, %190 : vector<8x128xf32>
    %c0_69 = arith.constant 0 : index
    %c0_70 = arith.constant 0 : index
    %192 = vector.load %arg8[%c0_69, %c0_70] : memref<8x128xf32, #tpu.memory_space<vmem>>, vector<8x128xf32>
    tpu.vector_store %arg8[%c0_69, %c0_70], %191 {strides = array<i32>} : memref<8x128xf32, #tpu.memory_space<vmem>>, vector<8x128xf32>,
    return
  }
}

</mosaic_0001>

<bundles_post_ra>
// kernel: tpu_custom_call.1
= control target key start
LH: loop header
LB: loop body
LE: loop exit
PB: predicated region body
PF: predicated region fallthrough
CT: control target
= control target key end

     0   :  { %13 = vsyncpa [#allocation3], 0  ;;  %s2245_s0 = inlined_call_operand.hbm [shape: f32[8,8,128], index: 0, kind: input, shape index: {}]   ;;  %s2246_s1 = inlined_call_operand.hbm [shape: f32[8,128], index: 1, kind: input, shape index: {}]   ;;  %s2247_s2 = inlined_call_operand.hbm [shape: f32[8,128], index: 2, kind: input, shape index: {}]   ;;  %s2248_s3 = inlined_call_operand.hbm [shape: f32[128,128], index: 3, kind: input, shape index: {}]   ;;  %s2249_s4 = inlined_call_operand.vmem [shape: f32[8,128], index: 4, kind: input, shape index: {}]   ;;  %s2250_s5 = inlined_call_operand.vmem [shape: f32[8,128], index: 5, kind: input, shape index: {}]   ;;  %s2251_s6 = inlined_call_operand.hbm [shape: f32[128,128], index: 6, kind: input, shape index: {}]   ;;  %s2252_s7 = inlined_call_operand.vmem [shape: f32[8,128], index: 7, kind: input, shape index: {}]   ;;  %s2253_s8 = inlined_call_operand.hbm [shape: f32[8,128], index: 8, kind: output, shape index: {}]  }
   0x1   :  { %14 = vsyncpa [#allocation6], 0 }
   0x2   :  { %15 = vsyncpa [#allocation9], 0 }
   0x3   :  { %16 = vsyncpa [#allocation4], 0  ;;  %s1865_s27 = smov [#allocation5]   ;;  %s1725_s9 = scalar_lea.hbm %s2246_s1, 128 }
   0x4   :  { %s35_s28 = sshll.u32 %s1865_s27, 4  ;;  %p1726_p0 = scmp.ne.s32.totalorder %s2246_s1, %s1725_s9  ;;  %s36_s28 = int_to_ptr.vmem [resolvable:$true] %s35_s28 }
   0x5   :  { %p1729_p1 = scmp.lt.u32.totalorder %s1725_s9, %s2246_s1 }
   0x7   :  { %p1731_p2 = pnand %p1729_p1, %p1726_p0 }
   0x9   :  { %1734 = shalt.err (!%p1731_p2)
}
   0xa   :  { %s1735_s14 = scalar_lea.vmem %s36_s28, 128  ;;  %p1740_p4 = scmp.lt.s32.totalorder %s36_s28, %s36_s28 }
   0xb   :  { %p1736_p3 = scmp.ne.s32.totalorder %s36_s28, %s1735_s14  ;;  %p1741_p5 = scmp.lt.s32.totalorder %s1735_s14, %s1735_s14 }
   0xd   :  { %p1742_p6 = por %p1741_p5, %p1740_p4 }
   0xf   :  { %p1743_p7 = pnand %p1742_p6, %p1736_p3 }
  0x11   :  { %1746 = shalt.err (!%p1743_p7)
}
  0x12   :  { %38 = dma.hbm_to_vmem [thread:$0]  %s2246_s1, 128, %s36_s28, [#allocation6]  }
  0x13   :  { %s1866_s17 = smov [#allocation8]   ;;  %s1867_s19 = smov [#allocation2]  }
  0x14   :  { %s54_s18 = sshll.u32 %s1866_s17, 4  ;;  %s22_s20 = sshll.u32 %s1867_s19, 4  ;;  %s55_s18 = int_to_ptr.vmem [resolvable:$true] %s54_s18  ;;  %s23_s20 = int_to_ptr.vmem [resolvable:$true] %s22_s20 }
  0x15   :  { %s1747_s23 = scalar_lea.hbm %s2248_s3, 2048 }
  0x16   :  { %p1748_p8 = scmp.ne.s32.totalorder %s2248_s3, %s1747_s23  ;;  %p1751_p9 = scmp.lt.u32.totalorder %s1747_s23, %s2248_s3 }
  0x18   :  { %p1753_p10 = pnand %p1751_p9, %p1748_p8 }
  0x1a   :  { %1756 = shalt.err (!%p1753_p10)
}
  0x1b   :  { %s1757_s1 = scalar_lea.vmem %s55_s18, 2048  ;;  %p1762_p12 = scmp.lt.s32.totalorder %s55_s18, %s55_s18 }
  0x1c   :  { %p1758_p11 = scmp.ne.s32.totalorder %s55_s18, %s1757_s1  ;;  %p1763_p13 = scmp.lt.s32.totalorder %s1757_s1, %s1757_s1 }
  0x1e   :  { %p1764_p0 = por %p1763_p13, %p1762_p12 }
  0x20   :  { %p1765_p1 = pnand %p1764_p0, %p1758_p11 }
  0x22   :  { %1768 = shalt.err (!%p1765_p1)
}
  0x23   :  { %s1868_s28 = smov 128   ;;  %s1869_s29 = smov 8  }
  0x24   :  { %60 = dma.hbm_to_vmem [thread:$0]  %s2248_s3, 2048, %s55_s18, [#allocation9], %s1868_s28, %s1868_s28, %s1869_s29  }
  0x25   :  { %s1769_s12 = scalar_lea.hbm %s2245_s0, 1024 }
  0x26   :  { %p1770_p2 = scmp.ne.s32.totalorder %s2245_s0, %s1769_s12  ;;  %p1773_p3 = scmp.lt.u32.totalorder %s1769_s12, %s2245_s0 }
  0x28   :  { %p1775_p4 = pnand %p1773_p3, %p1770_p2 }
  0x2a   :  { %1778 = shalt.err (!%p1775_p4)
}
  0x2b   :  { %s1779_s17 = scalar_lea.vmem %s23_s20, 1024  ;;  %p1784_p6 = scmp.lt.s32.totalorder %s23_s20, %s23_s20 }
  0x2c   :  { %p1780_p5 = scmp.ne.s32.totalorder %s23_s20, %s1779_s17  ;;  %p1785_p7 = scmp.lt.s32.totalorder %s1779_s17, %s1779_s17 }
  0x2e   :  { %p1786_p8 = por %p1785_p7, %p1784_p6 }
  0x30   :  { %p1787_p9 = pnand %p1786_p8, %p1780_p5 }
  0x32   :  { %1790 = shalt.err (!%p1787_p9)
}
  0x33   :  { %28 = dma.hbm_to_vmem [thread:$0]  %s2245_s0, 1024, %s23_s20, [#allocation3], %s1868_s28, %s1868_s28, %s1869_s29  }
  0x34   :  { %s1870_s19 = smov [#allocation7]   ;;  %s1871_s22 = smov [#allocation10]  }
  0x35   :  { %s45_s21 = sshll.u32 %s1870_s19, 4  ;;  %s70_s23 = sshll.u32 %s1871_s22, 4  ;;  %s46_s21 = int_to_ptr.vmem [resolvable:$true] %s45_s21  ;;  %s71_s23 = int_to_ptr.vmem [resolvable:$true] %s70_s23 }
  0x36   :  { %s1791_s26 = scalar_lea.hbm %s2247_s2, 128 }
  0x37   :  { %p1792_p10 = scmp.ne.s32.totalorder %s2247_s2, %s1791_s26  ;;  %p1795_p11 = scmp.lt.u32.totalorder %s1791_s26, %s2247_s2 }
  0x39   :  { %p1797_p12 = pnand %p1795_p11, %p1792_p10 }
  0x3b   :  { %1800 = shalt.err (!%p1797_p12)
}
  0x3c   :  { %s1801_s0 = scalar_lea.vmem %s46_s21, 128  ;;  %p1806_p0 = scmp.lt.s32.totalorder %s46_s21, %s46_s21 }
  0x3d   :  { %p1802_p13 = scmp.ne.s32.totalorder %s46_s21, %s1801_s0  ;;  %p1807_p1 = scmp.lt.s32.totalorder %s1801_s0, %s1801_s0 }
  0x3f   :  { %p1808_p2 = por %p1807_p1, %p1806_p0 }
  0x41   :  { %p1809_p3 = pnand %p1808_p2, %p1802_p13 }
  0x43   :  { %1812 = shalt.err (!%p1809_p3)
}
  0x44   :  { %48 = dma.hbm_to_vmem [thread:$0]  %s2247_s2, 128, %s46_s21, [#allocation6]  }
  0x45   :  { %s1813_s13 = scalar_lea.hbm %s2251_s6, 2048 }
  0x46   :  { %p1814_p4 = scmp.ne.s32.totalorder %s2251_s6, %s1813_s13  ;;  %p1817_p5 = scmp.lt.u32.totalorder %s1813_s13, %s2251_s6 }
  0x48   :  { %p1819_p6 = pnand %p1817_p5, %p1814_p4 }
  0x4a   :  { %1822 = shalt.err (!%p1819_p6)
}
  0x4b   :  { %s1823_s3 = scalar_lea.vmem %s71_s23, 2048  ;;  %p1828_p8 = scmp.lt.s32.totalorder %s71_s23, %s71_s23 }
  0x4c   :  { %p1824_p7 = scmp.ne.s32.totalorder %s71_s23, %s1823_s3  ;;  %p1829_p9 = scmp.lt.s32.totalorder %s1823_s3, %s1823_s3 }
  0x4e   :  { %p1830_p10 = por %p1829_p9, %p1828_p8 }
  0x50   :  { %p1831_p11 = pnand %p1830_p10, %p1824_p7 }
  0x52   :  { %1834 = shalt.err (!%p1831_p11)
}
  0x53   :  { %76 = dma.hbm_to_vmem [thread:$0]  %s2251_s6, 2048, %s71_s23, [#allocation9], %s1868_s28, %s1868_s28, %s1869_s29  }
  0x54   :  { %1857 = dma.done.wait [#allocation3], 1024  }
  0x55   :  { %1858 = vsyncadd [#allocation3], 4294966272 }
  0x56   :  { %1859 = dma.done.wait [#allocation6], 256  }
  0x57   :  { %1860 = vsyncadd [#allocation6], 4294967040 }
  0x58   :  { %1861 = dma.done.wait [#allocation9], 4096  }
  0x59   :  { %1862 = vsyncadd [#allocation9], 4294963200  ;;  %v1872_v0 = vmov 0.0|0.0   ;;  %vm1873_vm0 = vmmov 0   ;;  %v1874_v1 = vmov 0.0   ;;  %v122_v2 = vld [vmem:[#allocation8] sm:$0xff] }
  0x5a   :  { %1448 = vmatprep.subr.bf16.mxu0 %v1872_v0  ;;  %1165 = vmatprep.mubr.msk.f32.mxu0 %vm1873_vm0, %v1874_v1  ;;  %v123_v3 = vld [vmem:[#allocation8 + $0x8] sm:$0xff]  ;;  %v124_v4 = vld [vmem:[#allocation8 + $0x10] sm:$0xff]  ;;  %v125_v6 = vld [vmem:[#allocation8 + $0x18] sm:$0xff]  ;;  %s1875_s29 = smov 96   ;;  %s1876_s19 = smov 112  }
  0x5b   :  { %1472 = vmatprep.subr.bf16.mxu1 %v1872_v0  ;;  %1200 = vmatprep.mubr.msk.f32.mxu1 %vm1873_vm0, %v1874_v1  ;;  %v1998_v5 = vpack.c.bf16 %v123_v3, %v122_v2  ;;  %v2001_v7 = vpack.c.bf16 %v125_v6, %v124_v4  ;;  %v126_v8 = vld [vmem:[#allocation8 + $0x20] sm:$0xff]  ;;  %v127_v9 = vld [vmem:[#allocation8 + $0x28] sm:$0xff]  ;;  %v128_v11 = vld [vmem:[#allocation8 + $0x30] sm:$0xff]  ;;  %s1877_s23 = smov [#allocation11]  }
  0x5c   :  { %v2007_v10 = vpack.c.bf16 %v127_v9, %v126_v8  ;;  %v129_v12 = vld [vmem:[#allocation8 + $0x38] sm:$0xff]  ;;  %v130_v14 = vld [vmem:[#allocation8 + $0x40] sm:$0xff]  ;;  %v131_v15 = vld [vmem:[#allocation8 + $0x48] sm:$0xff]  ;;  %s952_s24 = sshll.u32 %s1877_s23, 4  ;;  %s953_s24 = int_to_ptr.vmem [resolvable:$true] %s952_s24 }
  0x5d   :  { %1450 = vmatpush3.bf16.msra.mxu0 %v1998_v5  ;;  %1474 = vmatpush3.bf16.msra.mxu1 %v1998_v5  ;;  %v2013_v13 = vpack.c.bf16 %v129_v12, %v128_v11  ;;  %v2019_v16 = vpack.c.bf16 %v131_v15, %v130_v14  ;;  %v132_v17 = vld [vmem:[#allocation8 + $0x50] sm:$0xff]  ;;  %v133_v18 = vld [vmem:[#allocation8 + $0x58] sm:$0xff]  ;;  %v134_v20 = vld [vmem:[#allocation8 + $0x60] sm:$0xff]  ;;  %s1835_s25 = scalar_lea.vmem %s953_s24, 128  ;;  %p1840_p13 = scmp.lt.s32.totalorder %s953_s24, %s953_s24 }
  0x5e   :  { %1451 = vmatprep.subr.bf16.mxu0 %v1872_v0  ;;  %1475 = vmatprep.subr.bf16.mxu1 %v1872_v0  ;;  %v2025_v19 = vpack.c.bf16 %v133_v18, %v132_v17  ;;  %v135_v21 = vld [vmem:[#allocation8 + $0x68] sm:$0xff]  ;;  %v136_v23 = vld [vmem:[#allocation8 + $0x70] sm:$0xff]  ;;  %v137_v24 = vld [vmem:[#allocation8 + $0x78] sm:$0xff]  ;;  %p1836_p12 = scmp.ne.s32.totalorder %s953_s24, %s1835_s25  ;;  %p1841_p0 = scmp.lt.s32.totalorder %s1835_s25, %s1835_s25 }
  0x5f   :  { %v2031_v22 = vpack.c.bf16 %v135_v21, %v134_v20  ;;  %v2037_v25 = vpack.c.bf16 %v137_v24, %v136_v23  ;;  %v96_v26 = vld [vmem:[#allocation2] sm:$0xff]  ;;  %v2065_v27 = vld [vmem:[#allocation7] sm:$0xff]  ;;  %v98_v11 = vld [vmem:[#allocation2 + $0x10] sm:$0xff] }
  0x60   :  { %v105_v28 = vmul.f32 %v2065_v27, %v96_v26  ;;  %v2071_v29 = vld [vmem:[%s2249_s4] sm:$0xff]  ;;  %v97_v50 = vld [vmem:[#allocation2 + $0x8] sm:$0xff]  ;;  %v107_v12 = vmul.f32 %v2065_v27, %v98_v11  ;;  %p1842_p1 = por %p1841_p0, %p1840_p13 }
  0x61   :  { %1453 = vmatpush3.bf16.msra.mxu0 %v2001_v7  ;;  %1477 = vmatpush3.bf16.msra.mxu1 %v2001_v7  ;;  %v2079_v38 = vld [vmem:[%s2250_s5] sm:$0xff]  ;;  %v106_v51 = vmul.f32 %v2065_v27, %v97_v50 }
  0x62   :  { %1454 = vmatprep.subr.bf16.mxu0 %v1872_v0  ;;  %1478 = vmatprep.subr.bf16.mxu1 %v1872_v0  ;;  %v114_v30 = vadd.f32 %v2071_v29, %v105_v28  ;;  %v2082_v45 = vld [vmem:[#allocation5] sm:$0xff]  ;;  %v116_v14 = vadd.f32 %v2071_v29, %v107_v12  ;;  %p1843_p2 = pnand %p1842_p1, %p1836_p12 }
  0x63   :  { %vm964_vm1 = vcmp.gt.f32.partialorder %v2082_v45, 0.0  ;;  %v115_v52 = vadd.f32 %v2071_v29, %v106_v51  ;;  %vm967_vm2 = vcmp.gt.f32.partialorder %v2082_v45, 1.0  ;;  %vm969_vm3 = vcmp.gt.f32.partialorder %v2082_v45, 2.0 }
  0x64   :  { %vm971_vm4 = vcmp.gt.f32.partialorder %v2082_v45, 3.0  ;;  %vm973_vm5 = vcmp.gt.f32.partialorder %v2082_v45, 4.0  ;;  %vm975_vm6 = vcmp.gt.f32.partialorder %v2082_v45, 5.0  ;;  %vm977_vm7 = vcmp.gt.f32.partialorder %v2082_v45, 6.0 }
  0x65   :  { %1456 = vmatpush3.bf16.msra.mxu0 %v2007_v10  ;;  %1480 = vmatpush3.bf16.msra.mxu1 %v2007_v10  ;;  %vm979_vm8 = vcmp.gt.f32.partialorder %v2082_v45, 7.0 }
  0x66   :  { %1457 = vmatprep.subr.bf16.mxu0 %v1872_v0  ;;  %1481 = vmatprep.subr.bf16.mxu1 %v1872_v0 }
  0x69   :  { %1459 = vmatpush3.bf16.msra.mxu0 %v2013_v13  ;;  %1483 = vmatpush3.bf16.msra.mxu1 %v2013_v13 }
  0x6a   :  { %1460 = vmatprep.subr.bf16.mxu0 %v1872_v0  ;;  %1484 = vmatprep.subr.bf16.mxu1 %v1872_v0 }
  0x6d   :  { %1462 = vmatpush3.bf16.msra.mxu0 %v2019_v16  ;;  %1486 = vmatpush3.bf16.msra.mxu1 %v2019_v16 }
  0x6e   :  { %1463 = vmatprep.subr.bf16.mxu0 %v1872_v0  ;;  %1487 = vmatprep.subr.bf16.mxu1 %v1872_v0 }
  0x71   :  { %1465 = vmatpush3.bf16.msra.mxu0 %v2025_v19  ;;  %1489 = vmatpush3.bf16.msra.mxu1 %v2025_v19 }
  0x72   :  { %1466 = vmatprep.subr.bf16.mxu0 %v1872_v0  ;;  %1490 = vmatprep.subr.bf16.mxu1 %v1872_v0 }
  0x75   :  { %1468 = vmatpush3.bf16.msra.mxu0 %v2031_v22  ;;  %1492 = vmatpush3.bf16.msra.mxu1 %v2031_v22 }
  0x76   :  { %1469 = vmatprep.subr.bf16.mxu0 %v1872_v0  ;;  %1493 = vmatprep.subr.bf16.mxu1 %v1872_v0 }
  0x79   :  { %1471 = vmatpush3.bf16.msra.mxu0 %v2037_v25  ;;  %1495 = vmatpush3.bf16.msra.mxu1 %v2037_v25 }
  0x7a   :  { %1496 = vmatprep.subr.bf16.mxu0 %v1872_v0  ;;  %1520 = vmatprep.subr.bf16.mxu1 %v1872_v0 }
  0x7c   :  { %1166 = vmatmul.mubr.f32.vlgmr.msra.gmra.mrb[0].mxu0 %v1874_v1 }
  0x7d   :  { %1498 = vmatpush3.bf16.msra.mxu0 %v1998_v5  ;;  %1235 = vmatprep.mubr.msk.f32.mxu0 %vm1873_vm0, %v1874_v1 }
  0x7e   :  { %1499 = vmatprep.subr.bf16.mxu0 %v1872_v0 }
  0x81   :  { %1501 = vmatpush3.bf16.msra.mxu0 %v2001_v7 }
  0x82   :  { %1502 = vmatprep.subr.bf16.mxu0 %v1872_v0 }
  0x85   :  { %1504 = vmatpush3.bf16.msra.mxu0 %v2007_v10 }
  0x86   :  { %1505 = vmatprep.subr.bf16.mxu0 %v1872_v0 }
  0x89   :  { %1507 = vmatpush3.bf16.msra.mxu0 %v2013_v13 }
  0x8a   :  { %1508 = vmatprep.subr.bf16.mxu0 %v1872_v0 }
  0x8d   :  { %1510 = vmatpush3.bf16.msra.mxu0 %v2019_v16 }
  0x8e   :  { %1511 = vmatprep.subr.bf16.mxu0 %v1872_v0 }
  0x91   :  { %1513 = vmatpush3.bf16.msra.mxu0 %v2025_v19 }
  0x92   :  { %1514 = vmatprep.subr.bf16.mxu0 %v1872_v0 }
  0x95   :  { %1516 = vmatpush3.bf16.msra.mxu0 %v2031_v22 }
  0x96   :  { %1517 = vmatprep.subr.bf16.mxu0 %v1872_v0 }
  0x99   :  { %1519 = vmatpush3.bf16.msra.mxu0 %v2037_v25 }
  0x9a   :  { %1544 = vmatprep.subr.bf16.mxu0 %v1872_v0 }
 0x14f   :  { %v204_v31 = vpop.f32.mrb[0].mxu0 }
 0x150   :  { %v208_v32 = vadd.f32 %v204_v31, %v114_v30  ;;  %v1167_v33 = vpop.f32.mrb[1].mxu0  ;;  %v219_v39 = vadd.f32 %v204_v31, %v2079_v38 }
 0x152   :  { %v963_v34 = vmul.f32 -1.442695, %v208_v32 }
 0x154   :  { %1677 = vpow2.f32 %v963_v34 }
 0x15e   :  { %v1678_v35 = vpop.eup %1677 }
 0x15f   :  { %v212_v36 = vadd.f32 1.0, %v1678_v35 }
 0x161   :  { %1679 = vrcp.f32 %v212_v36 }
 0x16b   :  { %v1680_v37 = vpop.eup %1679 }
 0x16c   :  { %215 = vrot.lane.b32.xlu0 %v1680_v37, %s1875_s29 }
 0x170   :  { %217 = vrot.lane.b32.xlu0 %v1680_v37, %s1876_s19 }
 0x1de   :  { %v216_v40 = vpop.permute.xlu0 %215 }
 0x1df   :  { %v220_v41 = vmul.f32 %v219_v39, %v216_v40  ;;  %v99_v39 = vld [vmem:[#allocation2 + $0x18] sm:$0xff] }
 0x1e0   :  { %v108_v40 = vmul.f32 %v2065_v27, %v99_v39 }
 0x1e1   :  { %v221_v42 = vadd.f32 %v220_v41, %v114_v30 }
 0x1e2   :  { %v218_v46 = vpop.permute.xlu0 %217  ;;  %v117_v41 = vadd.f32 %v2071_v29, %v108_v40 }
 0x1e3   :  { %1681 = vtanh.f32 %v221_v42 }
 0x1ed   :  { %v1682_v43 = vpop.eup %1681 }
 0x1ee   :  { %v223_v44 = vsub.f32 0.0, %v1682_v43 }
 0x1f0   :  { %v224_v47 = vmul.f32 %v223_v44, %v218_v46 }
 0x1f2   :  { %v225_v48 = vadd.f32 %v1682_v43, %v224_v47 }
 0x1f4   :  { %1201 = vmatmul.mubr.msk.f32.vlgmr.msra.gmra.mrb[0].mxu1 %vm964_vm1, %v225_v48  ;;  %v227_v49 = vsel %vm964_vm1, %v225_v48, 0.0 }
 0x1f5   :  { %1522 = vmatpush3.bf16.msra.mxu1 %v1998_v5  ;;  %1270 = vmatprep.mubr.msk.f32.mxu1 %vm1873_vm0, %v1874_v1 }
 0x1f6   :  { %1523 = vmatprep.subr.bf16.mxu1 %v1872_v0 }
 0x1f9   :  { %1525 = vmatpush3.bf16.msra.mxu1 %v2001_v7 }
 0x1fa   :  { %1526 = vmatprep.subr.bf16.mxu1 %v1872_v0 }
 0x1fd   :  { %1528 = vmatpush3.bf16.msra.mxu1 %v2007_v10 }
 0x1fe   :  { %1529 = vmatprep.subr.bf16.mxu1 %v1872_v0 }
 0x201   :  { %1531 = vmatpush3.bf16.msra.mxu1 %v2013_v13 }
 0x202   :  { %1532 = vmatprep.subr.bf16.mxu1 %v1872_v0 }
 0x205   :  { %1534 = vmatpush3.bf16.msra.mxu1 %v2019_v16 }
 0x206   :  { %1535 = vmatprep.subr.bf16.mxu1 %v1872_v0 }
 0x209   :  { %1537 = vmatpush3.bf16.msra.mxu1 %v2025_v19 }
 0x20a   :  { %1538 = vmatprep.subr.bf16.mxu1 %v1872_v0 }
 0x20d   :  { %1540 = vmatpush3.bf16.msra.mxu1 %v2031_v22 }
 0x20e   :  { %1541 = vmatprep.subr.bf16.mxu1 %v1872_v0 }
 0x211   :  { %1543 = vmatpush3.bf16.msra.mxu1 %v2037_v25 }
 0x212   :  { %1568 = vmatprep.subr.bf16.mxu1 %v1872_v0 }
 0x2c7   :  { %v294_v53 = vpop.f32.mrb[0].mxu1 }
 0x2c8   :  { %v298_v54 = vadd.f32 %v294_v53, %v115_v52  ;;  %v1202_v55 = vpop.f32.mrb[1].mxu1  ;;  %v309_v60 = vadd.f32 %v294_v53, %v2079_v38 }
 0x2ca   :  { %v966_v56 = vmul.f32 -1.442695, %v298_v54 }
 0x2cc   :  { %1683 = vpow2.f32 %v966_v56 }
 0x2d6   :  { %v1684_v57 = vpop.eup %1683 }
 0x2d7   :  { %v302_v58 = vadd.f32 1.0, %v1684_v57 }
 0x2d9   :  { %1685 = vrcp.f32 %v302_v58 }
 0x2e3   :  { %v1686_v59 = vpop.eup %1685 }
 0x2e4   :  { %305 = vrot.lane.b32.xlu1 %v1686_v59, %s1875_s29 }
 0x2e8   :  { %307 = vrot.lane.b32.xlu1 %v1686_v59, %s1876_s19 }
 0x356   :  { %v306_v61 = vpop.permute.xlu1 %305 }
 0x357   :  { %v310_v62 = vmul.f32 %v309_v60, %v306_v61  ;;  %v100_v60 = vld [vmem:[#allocation2 + $0x20] sm:$0xff] }
 0x358   :  { %v109_v61 = vmul.f32 %v2065_v27, %v100_v60 }
 0x359   :  { %v311_v63 = vadd.f32 %v310_v62, %v115_v52 }
 0x35a   :  { %v308_v4 = vpop.permute.xlu1 %307  ;;  %v118_v62 = vadd.f32 %v2071_v29, %v109_v61  ;;  %v858_v61 = vld [vmem:[#allocation10] sm:$0xff] }
 0x35b   :  { %1687 = vtanh.f32 %v311_v63 }
 0x365   :  { %v1688_v2 = vpop.eup %1687 }
 0x366   :  { %v313_v3 = vsub.f32 %v227_v49, %v1688_v2 }
 0x368   :  { %v314_v6 = vmul.f32 %v313_v3, %v308_v4 }
 0x36a   :  { %v315_v8 = vadd.f32 %v1688_v2, %v314_v6 }
 0x36c   :  { %v317_v9 = vsel %vm967_vm2, %v315_v8, %v227_v49 }
 0x36d   :  { %1236 = vmatmul.mubr.f32.vlgmr.msra.gmra.mrb[2].mxu0 %v317_v9 }
 0x36e   :  { %1546 = vmatpush3.bf16.msra.mxu0 %v1998_v5  ;;  %1305 = vmatprep.mubr.msk.f32.mxu0 %vm1873_vm0, %v1874_v1 }
 0x36f   :  { %1547 = vmatprep.subr.bf16.mxu0 %v1872_v0 }
 0x372   :  { %1549 = vmatpush3.bf16.msra.mxu0 %v2001_v7 }
 0x373   :  { %1550 = vmatprep.subr.bf16.mxu0 %v1872_v0 }
 0x376   :  { %1552 = vmatpush3.bf16.msra.mxu0 %v2007_v10 }
 0x377   :  { %1553 = vmatprep.subr.bf16.mxu0 %v1872_v0 }
 0x37a   :  { %1555 = vmatpush3.bf16.msra.mxu0 %v2013_v13 }
 0x37b   :  { %1556 = vmatprep.subr.bf16.mxu0 %v1872_v0 }
 0x37e   :  { %1558 = vmatpush3.bf16.msra.mxu0 %v2019_v16 }
 0x37f   :  { %1559 = vmatprep.subr.bf16.mxu0 %v1872_v0 }
 0x382   :  { %1561 = vmatpush3.bf16.msra.mxu0 %v2025_v19 }
 0x383   :  { %1562 = vmatprep.subr.bf16.mxu0 %v1872_v0 }
 0x386   :  { %1564 = vmatpush3.bf16.msra.mxu0 %v2031_v22 }
 0x387   :  { %1565 = vmatprep.subr.bf16.mxu0 %v1872_v0 }
 0x38a   :  { %1567 = vmatpush3.bf16.msra.mxu0 %v2037_v25 }
 0x38b   :  { %1592 = vmatprep.subr.bf16.mxu0 %v1872_v0 }
 0x440   :  { %v384_v15 = vpop.f32.mrb[2].mxu0 }
 0x441   :  { %v388_v17 = vadd.f32 %v384_v15, %v116_v14  ;;  %v1237_v18 = vpop.f32.mrb[3].mxu0  ;;  %v399_v26 = vadd.f32 %v384_v15, %v2079_v38 }
 0x443   :  { %v968_v20 = vmul.f32 -1.442695, %v388_v17 }
 0x445   :  { %1689 = vpow2.f32 %v968_v20 }
 0x44f   :  { %v1690_v21 = vpop.eup %1689 }
 0x450   :  { %v392_v23 = vadd.f32 1.0, %v1690_v21 }
 0x452   :  { %1691 = vrcp.f32 %v392_v23 }
 0x45c   :  { %v1692_v24 = vpop.eup %1691 }
 0x45d   :  { %397 = vrot.lane.b32.xlu1 %v1692_v24, %s1876_s19  ;;  %395 = vrot.lane.b32.xlu0 %v1692_v24, %s1875_s29 }
 0x4cf   :  { %v396_v28 = vpop.permute.xlu0 %395  ;;  %v398_v34 = vpop.permute.xlu1 %397 }
 0x4d0   :  { %v400_v30 = vmul.f32 %v399_v26, %v396_v28 }
 0x4d2   :  { %v401_v31 = vadd.f32 %v400_v30, %v116_v14 }
 0x4d4   :  { %1693 = vtanh.f32 %v401_v31 }
 0x4de   :  { %v1694_v32 = vpop.eup %1693 }
 0x4df   :  { %v403_v33 = vsub.f32 %v317_v9, %v1694_v32 }
 0x4e1   :  { %v404_v35 = vmul.f32 %v403_v33, %v398_v34 }
 0x4e3   :  { %v405_v36 = vadd.f32 %v1694_v32, %v404_v35 }
 0x4e5   :  { %v407_v37 = vsel %vm969_vm3, %v405_v36, %v317_v9 }
 0x4e6   :  { %1271 = vmatmul.mubr.f32.vlgmr.msra.gmra.mrb[2].mxu1 %v407_v37 }
 0x4e7   :  { %1570 = vmatpush3.bf16.msra.mxu1 %v1998_v5  ;;  %1340 = vmatprep.mubr.msk.f32.mxu1 %vm1873_vm0, %v1874_v1 }
 0x4e8   :  { %1571 = vmatprep.subr.bf16.mxu1 %v1872_v0 }
 0x4eb   :  { %1573 = vmatpush3.bf16.msra.mxu1 %v2001_v7 }
 0x4ec   :  { %1574 = vmatprep.subr.bf16.mxu1 %v1872_v0 }
 0x4ef   :  { %1576 = vmatpush3.bf16.msra.mxu1 %v2007_v10 }
 0x4f0   :  { %1577 = vmatprep.subr.bf16.mxu1 %v1872_v0 }
 0x4f3   :  { %1579 = vmatpush3.bf16.msra.mxu1 %v2013_v13 }
 0x4f4   :  { %1580 = vmatprep.subr.bf16.mxu1 %v1872_v0 }
 0x4f7   :  { %1582 = vmatpush3.bf16.msra.mxu1 %v2019_v16 }
 0x4f8   :  { %1583 = vmatprep.subr.bf16.mxu1 %v1872_v0 }
 0x4fb   :  { %1585 = vmatpush3.bf16.msra.mxu1 %v2025_v19 }
 0x4fc   :  { %1586 = vmatprep.subr.bf16.mxu1 %v1872_v0 }
 0x4ff   :  { %1588 = vmatpush3.bf16.msra.mxu1 %v2031_v22 }
 0x500   :  { %1589 = vmatprep.subr.bf16.mxu1 %v1872_v0 }
 0x503   :  { %1591 = vmatpush3.bf16.msra.mxu1 %v2037_v25 }
 0x504   :  { %1616 = vmatprep.subr.bf16.mxu1 %v1872_v0 }
 0x5b9   :  { %v474_v42 = vpop.f32.mrb[2].mxu1 }
 0x5ba   :  { %v478_v43 = vadd.f32 %v474_v42, %v117_v41  ;;  %v1272_v44 = vpop.f32.mrb[3].mxu1  ;;  %v489_v50 = vadd.f32 %v474_v42, %v2079_v38 }
 0x5bc   :  { %v970_v46 = vmul.f32 -1.442695, %v478_v43 }
 0x5be   :  { %1695 = vpow2.f32 %v970_v46 }
 0x5c8   :  { %v1696_v47 = vpop.eup %1695 }
 0x5c9   :  { %v482_v48 = vadd.f32 1.0, %v1696_v47 }
 0x5cb   :  { %1697 = vrcp.f32 %v482_v48 }
 0x5d5   :  { %v1698_v49 = vpop.eup %1697 }
 0x5d6   :  { %487 = vrot.lane.b32.xlu1 %v1698_v49, %s1876_s19  ;;  %485 = vrot.lane.b32.xlu0 %v1698_v49, %s1875_s29 }
 0x648   :  { %v486_v51 = vpop.permute.xlu0 %485  ;;  %v488_v56 = vpop.permute.xlu1 %487 }
 0x649   :  { %v490_v52 = vmul.f32 %v489_v50, %v486_v51 }
 0x64b   :  { %v491_v53 = vadd.f32 %v490_v52, %v117_v41  ;;  %v102_v41 = vld [vmem:[#allocation2 + $0x30] sm:$0xff] }
 0x64c   :  { %v111_v42 = vmul.f32 %v2065_v27, %v102_v41 }
 0x64d   :  { %1699 = vtanh.f32 %v491_v53 }
 0x64e   :  { %v120_v43 = vadd.f32 %v2071_v29, %v111_v42 }
 0x657   :  { %v1700_v54 = vpop.eup %1699 }
 0x658   :  { %v493_v55 = vsub.f32 %v407_v37, %v1700_v54 }
 0x65a   :  { %v494_v57 = vmul.f32 %v493_v55, %v488_v56 }
 0x65c   :  { %v495_v58 = vadd.f32 %v1700_v54, %v494_v57 }
 0x65e   :  { %v497_v59 = vsel %vm971_vm4, %v495_v58, %v407_v37 }
 0x65f   :  { %1306 = vmatmul.mubr.f32.vlgmr.msra.gmra.mrb[4].mxu0 %v497_v59 }
 0x660   :  { %1594 = vmatpush3.bf16.msra.mxu0 %v1998_v5  ;;  %1375 = vmatprep.mubr.msk.f32.mxu0 %vm1873_vm0, %v1874_v1 }
 0x661   :  { %1595 = vmatprep.subr.bf16.mxu0 %v1872_v0 }
 0x664   :  { %1597 = vmatpush3.bf16.msra.mxu0 %v2001_v7 }
 0x665   :  { %1598 = vmatprep.subr.bf16.mxu0 %v1872_v0 }
 0x668   :  { %1600 = vmatpush3.bf16.msra.mxu0 %v2007_v10 }
 0x669   :  { %1601 = vmatprep.subr.bf16.mxu0 %v1872_v0 }
 0x66c   :  { %1603 = vmatpush3.bf16.msra.mxu0 %v2013_v13 }
 0x66d   :  { %1604 = vmatprep.subr.bf16.mxu0 %v1872_v0 }
 0x670   :  { %1606 = vmatpush3.bf16.msra.mxu0 %v2019_v16 }
 0x671   :  { %1607 = vmatprep.subr.bf16.mxu0 %v1872_v0 }
 0x674   :  { %1609 = vmatpush3.bf16.msra.mxu0 %v2025_v19 }
 0x675   :  { %1610 = vmatprep.subr.bf16.mxu0 %v1872_v0 }
 0x678   :  { %1612 = vmatpush3.bf16.msra.mxu0 %v2031_v22 }
 0x679   :  { %1613 = vmatprep.subr.bf16.mxu0 %v1872_v0 }
 0x67c   :  { %1615 = vmatpush3.bf16.msra.mxu0 %v2037_v25 }
 0x67d   :  { %1640 = vmatprep.subr.bf16.mxu0 %v1872_v0 }
 0x732   :  { %v564_v63 = vpop.f32.mrb[4].mxu0 }
 0x733   :  { %v568_v2 = vadd.f32 %v564_v63, %v118_v62  ;;  %v1307_v3 = vpop.f32.mrb[5].mxu0  ;;  %v579_v11 = vadd.f32 %v564_v63, %v2079_v38  ;;  %v860_v63 = vld [vmem:[#allocation10 + $0x10] sm:$0xff] }
 0x734   :  { %v861_v3 = vld [vmem:[#allocation10 + $0x18] sm:$0xff] }
 0x735   :  { %v972_v4 = vmul.f32 -1.442695, %v568_v2 }
 0x737   :  { %1701 = vpow2.f32 %v972_v4  ;;  %v1644_v4 = vpack.c.bf16 %v861_v3, %v860_v63 }
 0x741   :  { %v1702_v6 = vpop.eup %1701 }
 0x742   :  { %v572_v8 = vadd.f32 1.0, %v1702_v6  ;;  %v862_v6 = vld [vmem:[#allocation10 + $0x20] sm:$0xff] }
 0x744   :  { %1703 = vrcp.f32 %v572_v8  ;;  %v863_v8 = vld [vmem:[#allocation10 + $0x28] sm:$0xff] }
 0x74e   :  { %v1704_v9 = vpop.eup %1703 }
 0x74f   :  { %577 = vrot.lane.b32.xlu1 %v1704_v9, %s1876_s19  ;;  %575 = vrot.lane.b32.xlu0 %v1704_v9, %s1875_s29  ;;  %v1647_v9 = vpack.c.bf16 %v863_v8, %v862_v6 }
 0x7c1   :  { %v576_v12 = vpop.permute.xlu0 %575  ;;  %v578_v20 = vpop.permute.xlu1 %577 }
 0x7c2   :  { %v580_v14 = vmul.f32 %v579_v11, %v576_v12  ;;  %v103_v11 = vld [vmem:[#allocation2 + $0x38] sm:$0xff] }
 0x7c3   :  { %v112_v12 = vmul.f32 %v2065_v27, %v103_v11 }
 0x7c4   :  { %v581_v15 = vadd.f32 %v580_v14, %v118_v62  ;;  %v859_v62 = vld [vmem:[#allocation10 + $0x8] sm:$0xff] }
 0x7c5   :  { %v1641_v2 = vpack.c.bf16 %v859_v62, %v858_v61  ;;  %v121_v14 = vadd.f32 %v2071_v29, %v112_v12 }
 0x7c6   :  { %1705 = vtanh.f32 %v581_v15 }
 0x7d0   :  { %v1706_v17 = vpop.eup %1705 }
 0x7d1   :  { %v583_v18 = vsub.f32 %v497_v59, %v1706_v17 }
 0x7d3   :  { %v584_v21 = vmul.f32 %v583_v18, %v578_v20 }
 0x7d5   :  { %v585_v23 = vadd.f32 %v1706_v17, %v584_v21 }
 0x7d7   :  { %v587_v24 = vsel %vm973_vm5, %v585_v23, %v497_v59 }
 0x7d8   :  { %1341 = vmatmul.mubr.f32.vlgmr.msra.gmra.mrb[4].mxu1 %v587_v24 }
 0x7d9   :  { %1618 = vmatpush3.bf16.msra.mxu1 %v1998_v5  ;;  %1410 = vmatprep.mubr.msk.f32.mxu1 %vm1873_vm0, %v1874_v1  ;;  %v101_v5 = vld [vmem:[#allocation2 + $0x28] sm:$0xff] }
 0x7da   :  { %1619 = vmatprep.subr.bf16.mxu1 %v1872_v0 }
 0x7dd   :  { %1621 = vmatpush3.bf16.msra.mxu1 %v2001_v7  ;;  %v110_v7 = vmul.f32 %v2065_v27, %v101_v5  ;;  %v865_v5 = vld [vmem:[#allocation10 + $0x38] sm:$0xff] }
 0x7de   :  { %1622 = vmatprep.subr.bf16.mxu1 %v1872_v0 }
 0x7e1   :  { %1624 = vmatpush3.bf16.msra.mxu1 %v2007_v10  ;;  %v119_v10 = vadd.f32 %v2071_v29, %v110_v7 }
 0x7e2   :  { %1625 = vmatprep.subr.bf16.mxu1 %v1872_v0 }
 0x7e5   :  { %1627 = vmatpush3.bf16.msra.mxu1 %v2013_v13 }
 0x7e6   :  { %1628 = vmatprep.subr.bf16.mxu1 %v1872_v0 }
 0x7e9   :  { %1630 = vmatpush3.bf16.msra.mxu1 %v2019_v16 }
 0x7ea   :  { %1631 = vmatprep.subr.bf16.mxu1 %v1872_v0 }
 0x7ed   :  { %1633 = vmatpush3.bf16.msra.mxu1 %v2025_v19 }
 0x7ee   :  { %1634 = vmatprep.subr.bf16.mxu1 %v1872_v0 }
 0x7f1   :  { %1636 = vmatpush3.bf16.msra.mxu1 %v2031_v22 }
 0x7f2   :  { %1637 = vmatprep.subr.bf16.mxu1 %v1872_v0 }
 0x7f5   :  { %1639 = vmatpush3.bf16.msra.mxu1 %v2037_v25 }
 0x8ab   :  { %v654_v13 = vpop.f32.mrb[4].mxu1 }
 0x8ac   :  { %v658_v26 = vadd.f32 %v654_v13, %v119_v10  ;;  %v1342_v16 = vpop.f32.mrb[5].mxu1  ;;  %v669_v22 = vadd.f32 %v654_v13, %v2079_v38  ;;  %v867_v13 = vld [vmem:[#allocation10 + $0x48] sm:$0xff] }
 0x8ad   :  { %v869_v16 = vld [vmem:[#allocation10 + $0x58] sm:$0xff] }
 0x8ae   :  { %v974_v28 = vmul.f32 -1.442695, %v658_v26  ;;  %v868_v26 = vld [vmem:[#allocation10 + $0x50] sm:$0xff] }
 0x8af   :  { %v1656_v29 = vpack.c.bf16 %v869_v16, %v868_v26 }
 0x8b0   :  { %1707 = vpow2.f32 %v974_v28  ;;  %v870_v28 = vld [vmem:[#allocation10 + $0x60] sm:$0xff] }
 0x8ba   :  { %v1708_v30 = vpop.eup %1707 }
 0x8bb   :  { %v662_v19 = vadd.f32 1.0, %v1708_v30  ;;  %v871_v30 = vld [vmem:[#allocation10 + $0x68] sm:$0xff] }
 0x8bd   :  { %1709 = vrcp.f32 %v662_v19  ;;  %v1659_v19 = vpack.c.bf16 %v871_v30, %v870_v28 }
 0x8c7   :  { %v1710_v31 = vpop.eup %1709 }
 0x8c8   :  { %667 = vrot.lane.b32.xlu1 %v1710_v31, %s1876_s19  ;;  %665 = vrot.lane.b32.xlu0 %v1710_v31, %s1875_s29 }
 0x93a   :  { %v666_v25 = vpop.permute.xlu0 %665  ;;  %v668_v36 = vpop.permute.xlu1 %667 }
 0x93b   :  { %v670_v32 = vmul.f32 %v669_v22, %v666_v25  ;;  %v872_v22 = vld [vmem:[#allocation10 + $0x70] sm:$0xff]  ;;  %v873_v25 = vld [vmem:[#allocation10 + $0x78] sm:$0xff] }
 0x93d   :  { %v671_v33 = vadd.f32 %v670_v32, %v119_v10  ;;  %v866_v10 = vld [vmem:[#allocation10 + $0x40] sm:$0xff]  ;;  %v1662_v32 = vpack.c.bf16 %v873_v25, %v872_v22 }
 0x93e   :  { %v1653_v27 = vpack.c.bf16 %v867_v13, %v866_v10 }
 0x93f   :  { %1711 = vtanh.f32 %v671_v33 }
 0x949   :  { %v1712_v34 = vpop.eup %1711 }
 0x94a   :  { %v673_v35 = vsub.f32 %v587_v24, %v1712_v34 }
 0x94c   :  { %v674_v37 = vmul.f32 %v673_v35, %v668_v36 }
 0x94e   :  { %v675_v39 = vadd.f32 %v1712_v34, %v674_v37 }
 0x950   :  { %v677_v40 = vsel %vm975_vm6, %v675_v39, %v587_v24  ;;  %v864_v24 = vld [vmem:[#allocation10 + $0x30] sm:$0xff] }
 0x951   :  { %1376 = vmatmul.mubr.f32.vlgmr.msra.gmra.mrb[6].mxu0 %v677_v40  ;;  %v1650_v7 = vpack.c.bf16 %v865_v5, %v864_v24 }
 0x952   :  { %1445 = vmatprep.mubr.msk.f32.mxu0 %vm1873_vm0, %v1874_v1  ;;  %1642 = vmatpush3.bf16.msra.mxu0 %v1641_v2 }
 0x953   :  { %1643 = vmatprep.subr.bf16.mxu0 %v1872_v0 }
 0x956   :  { %1645 = vmatpush3.bf16.msra.mxu0 %v1644_v4 }
 0x957   :  { %1646 = vmatprep.subr.bf16.mxu0 %v1872_v0 }
 0x95a   :  { %1648 = vmatpush3.bf16.msra.mxu0 %v1647_v9 }
 0x95b   :  { %1649 = vmatprep.subr.bf16.mxu0 %v1872_v0 }
 0x95e   :  { %1651 = vmatpush3.bf16.msra.mxu0 %v1650_v7 }
 0x95f   :  { %1652 = vmatprep.subr.bf16.mxu0 %v1872_v0 }
 0x962   :  { %1654 = vmatpush3.bf16.msra.mxu0 %v1653_v27 }
 0x963   :  { %1655 = vmatprep.subr.bf16.mxu0 %v1872_v0 }
 0x966   :  { %1657 = vmatpush3.bf16.msra.mxu0 %v1656_v29 }
 0x967   :  { %1658 = vmatprep.subr.bf16.mxu0 %v1872_v0 }
 0x96a   :  { %1660 = vmatpush3.bf16.msra.mxu0 %v1659_v19 }
 0x96b   :  { %1661 = vmatprep.subr.bf16.mxu0 %v1872_v0  ;;  %v874_v0 = vld [vmem:[%s2252_s7] sm:$0xff] }
 0x96e   :  { %1663 = vmatpush3.bf16.msra.mxu0 %v1662_v32 }
 0xa24   :  { %v744_v44 = vpop.f32.mrb[6].mxu0 }
 0xa25   :  { %v748_v46 = vadd.f32 %v744_v44, %v120_v43  ;;  %v1377_v47 = vpop.f32.mrb[7].mxu0  ;;  %v759_v1 = vadd.f32 %v744_v44, %v2079_v38 }
 0xa27   :  { %v976_v48 = vmul.f32 -1.442695, %v748_v46 }
 0xa29   :  { %1713 = vpow2.f32 %v976_v48 }
 0xa33   :  { %v1714_v49 = vpop.eup %1713 }
 0xa34   :  { %v752_v50 = vadd.f32 1.0, %v1714_v49 }
 0xa36   :  { %1715 = vrcp.f32 %v752_v50 }
 0xa40   :  { %v1716_v51 = vpop.eup %1715 }
 0xa41   :  { %757 = vrot.lane.b32.xlu1 %v1716_v51, %s1876_s19  ;;  %755 = vrot.lane.b32.xlu0 %v1716_v51, %s1875_s29 }
 0xab3   :  { %v756_v52 = vpop.permute.xlu0 %755  ;;  %v758_v57 = vpop.permute.xlu1 %757 }
 0xab4   :  { %v760_v53 = vmul.f32 %v759_v1, %v756_v52 }
 0xab6   :  { %v761_v54 = vadd.f32 %v760_v53, %v120_v43 }
 0xab8   :  { %1717 = vtanh.f32 %v761_v54 }
 0xac2   :  { %v1718_v55 = vpop.eup %1717 }
 0xac3   :  { %v763_v56 = vsub.f32 %v677_v40, %v1718_v55 }
 0xac5   :  { %v764_v58 = vmul.f32 %v763_v56, %v758_v57 }
 0xac7   :  { %v765_v59 = vadd.f32 %v1718_v55, %v764_v58 }
 0xac9   :  { %v2212_v60 = vsel %vm977_vm7, %v765_v59, %v677_v40 }
 0xaca   :  { %1411 = vmatmul.mubr.f32.vlgmr.msra.gmra.mrb[6].mxu1 %v2212_v60 }
 0xb9d   :  { %v834_v15 = vpop.f32.mrb[6].mxu1 }
 0xb9e   :  { %v838_v17 = vadd.f32 %v834_v15, %v121_v14  ;;  %v1412_v18 = vpop.f32.mrb[7].mxu1  ;;  %v849_v33 = vadd.f32 %v834_v15, %v2079_v38 }
 0xba0   :  { %v978_v20 = vmul.f32 -1.442695, %v838_v17 }
 0xba2   :  { %1719 = vpow2.f32 %v978_v20 }
 0xbac   :  { %v1720_v21 = vpop.eup %1719 }
 0xbad   :  { %v842_v23 = vadd.f32 1.0, %v1720_v21 }
 0xbaf   :  { %1721 = vrcp.f32 %v842_v23 }
 0xbb9   :  { %v1722_v31 = vpop.eup %1721 }
 0xbba   :  { %847 = vrot.lane.b32.xlu1 %v1722_v31, %s1876_s19  ;;  %845 = vrot.lane.b32.xlu0 %v1722_v31, %s1875_s29 }
 0xc2c   :  { %v846_v34 = vpop.permute.xlu0 %845  ;;  %v848_v40 = vpop.permute.xlu1 %847 }
 0xc2d   :  { %v850_v35 = vmul.f32 %v849_v33, %v846_v34 }
 0xc2f   :  { %v851_v36 = vadd.f32 %v850_v35, %v121_v14 }
 0xc31   :  { %1723 = vtanh.f32 %v851_v36 }
 0xc3b   :  { %v1724_v37 = vpop.eup %1723 }
 0xc3c   :  { %v853_v39 = vsub.f32 %v2212_v60, %v1724_v37 }
 0xc3e   :  { %v854_v41 = vmul.f32 %v853_v39, %v848_v40 }
 0xc40   :  { %v855_v42 = vadd.f32 %v1724_v37, %v854_v41 }
 0xc42   :  { %v857_v43 = vsel %vm979_vm8, %v855_v42, %v2212_v60 }
 0xc43   :  { %1446 = vmatmul.mubr.f32.vlgmr.msra.gmra.mrb[8].mxu0 %v857_v43 }
 0xd16   :  { %v941_v38 = vpop.f32.mrb[8].mxu0 }
 0xd17   :  { %v942_v44 = vadd.f32 %v941_v38, %v874_v0  ;;  %v1447_v46 = vpop.f32.mrb[9].mxu0 }
 0xd19   :  { %945 = vst [vmem:[#allocation11] sm:$0xff] %v942_v44 }
 0xd1a   :  { %1846 = shalt.err (!%p1843_p2)
}
 0xd1b   :  { %s1847_s1 = scalar_lea.hbm %s2253_s8, 128 }
 0xd1c   :  { %p1848_p3 = scmp.ne.s32.totalorder %s2253_s8, %s1847_s1  ;;  %p1851_p4 = scmp.lt.u32.totalorder %s1847_s1, %s2253_s8 }
 0xd1e   :  { %p1853_p5 = pnand %p1851_p4, %p1848_p3 }
 0xd20   :  { %1856 = shalt.err (!%p1853_p5)
}
 0xd21   :  { %955 = dma.vmem_to_hbm [thread:$0]  %s953_s24, 128, %s2253_s8, [#allocation4]  }
 0xd22   :  { %1863 = dma.done.wait [#allocation4], 128  }
 0xd23   :  { %1864 = vsyncadd [#allocation4], 4294967168 }
 0xd24   :  { %959 = vsyncpa [#allocation3], 1 }
 0xd25   :  { %960 = vsyncpa [#allocation6], 1 }
 0xd26   :  { %961 = vsyncpa [#allocation9], 1 }
 0xd27   :  { %962 = vsyncpa [#allocation4], 1 }

</bundles_post_ra>
